<compile_context>
chip_gen: v6e
topology: v6e:2x2x1
jax: 0.10.0
libtpu: 0.0.40
codegen_flags: <defaults>
</compile_context>

<pallas_src>
import functools

import jax
import jax.numpy as jnp
from jax import lax
from jax.experimental import pallas as pl
from jax.experimental.pallas import tpu as pltpu


def _vmem_limit_bytes():
    """Per-generation VMEM plan: ~75% of physical capacity."""
    cap = None
    try:
        info = pltpu.get_tpu_info()
        cap = getattr(info, "vmem_capacity_bytes", None)
    except Exception:
        cap = None
    if not cap:
        cap = 64 * 1024 * 1024          # conservative fallback: v7x physical
    return max(int(cap * 0.75), 32 * 1024 * 1024)


def _mmd_kernel(x_ref, y_ref, o_ref, gxx_acc, gyy_acc, gxy_acc,
                *, batch, feat_dim, tile_d, ragged):
    # x_ref, y_ref: (N, tile_d) slices of x / y (native dtype)
    # o_ref:        (1,) f32 scalar output in SMEM (resident across the grid)
    # g*_acc:       (N, N) f32 VMEM accumulators, resident across the D grid
    k = pl.program_id(0)

    @pl.when(k == 0)
    def _init():
        gxx_acc[...] = jnp.zeros_like(gxx_acc)
        gyy_acc[...] = jnp.zeros_like(gyy_acc)
        gxy_acc[...] = jnp.zeros_like(gxy_acc)

    x = x_ref[...]
    y = y_ref[...]

    if ragged:
        # Last tile extends past D; out-of-bounds lanes hold garbage -> zero
        # them (zero columns leave the Gram / pairwise distances unchanged).
        col = lax.broadcasted_iota(jnp.int32, x.shape, 1) + k * tile_d
        valid = col < feat_dim
        zero = jnp.zeros((), x.dtype)
        x = jnp.where(valid, x, zero)
        y = jnp.where(valid, y, zero)

    # Contract dim 1 of both operands (no transpose), f32 MXU accumulation.
    dn = (((1,), (1,)), ((), ()))
    gxx_acc[...] += lax.dot_general(x, x, dn, preferred_element_type=jnp.float32)
    gyy_acc[...] += lax.dot_general(y, y, dn, preferred_element_type=jnp.float32)
    gxy_acc[...] += lax.dot_general(x, y, dn, preferred_element_type=jnp.float32)

    @pl.when(k == pl.num_programs(0) - 1)
    def _epilogue():
        gxx = gxx_acc[...]
        gyy = gyy_acc[...]
        gxy = gxy_acc[...]
        nb = gxx.shape[0]

        rid = lax.broadcasted_iota(jnp.int32, (nb, nb), 0)
        cid = lax.broadcasted_iota(jnp.int32, (nb, nb), 1)
        is_diag = rid == cid

        # Squared norms straight from the Gram diagonals (consistent with the
        # cross terms, so diag(sq_xx) == diag(sq_yy) == 0 exactly).  The diag
        # select is done once per block and reused for both orientations.
        mx = jnp.where(is_diag, gxx, 0.0)
        my = jnp.where(is_diag, gyy, 0.0)
        nx_col = jnp.sum(mx, axis=1, keepdims=True)   # (N, 1)  ||x_i||^2
        nx_row = jnp.sum(mx, axis=0, keepdims=True)   # (1, N)
        ny_col = jnp.sum(my, axis=1, keepdims=True)
        ny_row = jnp.sum(my, axis=0, keepdims=True)

        # exp(-mean((a-b)^2)/dim) == exp(-||a-b||^2 / dim^2)
        inv_dim2 = jnp.float32(1.0 / (feat_dim * feat_dim))

        def block_sum(ncol, nrow, g):
            sq = jnp.maximum(ncol + nrow - 2.0 * g, 0.0)   # clamp cancellation
            return jnp.sum(jnp.exp(-sq * inv_dim2))        # EUP exp + reduce

        total = (block_sum(nx_col, nx_row, gxx)
                 + block_sum(ny_col, ny_row, gyy)
                 - 2.0 * block_sum(nx_col, ny_row, gxy))
        o_ref[0] = total * jnp.float32(1.0 / (batch * batch))


def mmd_loss(latent_a, latent_b, *, max_tile_d=None):
    # Glue: flatten to (N, D) like torch .view(N, -1).  No concat, no pad.
    x = latent_a.reshape(latent_a.shape[0], -1)
    y = latent_b.reshape(latent_b.shape[0], -1)
    assert x.shape == y.shape, "MMDLoss requires matching (N, D) shapes"
    n, d = x.shape
    itemsize = jnp.dtype(x.dtype).itemsize

    # Auto-size the D tile from the VMEM budget: double-buffered (n, td)
    # blocks for x and y plus three (n, n) f32 accumulators within ~75% of
    # the per-generation vmem limit.
    vmem_limit = _vmem_limit_bytes()
    budget = int(vmem_limit * 0.75)
    acc_bytes = 3 * n * n * 4
    per_col = 2 * 2 * n * itemsize            # 2 inputs x 2 buffers x n rows
    fit_td = max((budget - acc_bytes) // per_col, 128)
    if max_tile_d is not None:
        fit_td = min(fit_td, max_tile_d)

    if d <= fit_td:
        td = d                                 # full width, single grid step
        ragged = False
    else:
        td = max((fit_td // 128) * 128, 128)   # 128-multiple streaming tile
        ragged = (d % td) != 0                 # tail masked in-kernel
    n_steps = -(-d // td)                      # cdiv

    kernel = functools.partial(
        _mmd_kernel, batch=n, feat_dim=d, tile_d=td, ragged=ragged)

    out = pl.pallas_call(
        kernel,
        out_shape=jax.ShapeDtypeStruct((1,), jnp.float32),
        grid_spec=pltpu.PrefetchScalarGridSpec(
            num_scalar_prefetch=0,
            grid=(n_steps,),
            in_specs=[pl.BlockSpec((n, td), lambda k: (0, k)),
                      pl.BlockSpec((n, td), lambda k: (0, k))],
            out_specs=pl.BlockSpec(memory_space=pltpu.MemorySpace.SMEM),
            scratch_shapes=[pltpu.VMEM((n, n), jnp.float32),
                            pltpu.VMEM((n, n), jnp.float32),
                            pltpu.VMEM((n, n), jnp.float32)],
        ),
        compiler_params=pltpu.CompilerParams(
            dimension_semantics=("arbitrary",),   # D axis is a reduction
            vmem_limit_bytes=vmem_limit,
        ),
    )(x, y)
    return out[0]


def _mmd_loss_ref(latent_a, latent_b):
    # Pure-JAX reference mirroring the PyTorch code exactly.
    x = latent_a.reshape(latent_a.shape[0], -1).astype(jnp.float32)
    y = latent_b.reshape(latent_b.shape[0], -1).astype(jnp.float32)

    def compute_kernel(a, b):
        dim = a.shape[1]
        diff = a[:, None, :] - b[None, :, :]
        return jnp.exp(-jnp.mean(diff ** 2, axis=2) / dim)

    return (jnp.mean(compute_kernel(x, x))
            + jnp.mean(compute_kernel(y, y))
            - 2.0 * jnp.mean(compute_kernel(x, y)))


if __name__ == "__main__":
    key = jax.random.PRNGKey(0)
    ka, kb, kc, kd, ke, kf = jax.random.split(key, 6)

    # Case 1: batch=2, channels=4, spatial=16x16 -> D=1024 (single full step).
    latent_a = jax.random.normal(ka, (2, 4, 16, 16), dtype=jnp.float32)
    latent_b = jax.random.normal(kb, (2, 4, 16, 16), dtype=jnp.float32)
    loss = jax.block_until_ready(mmd_loss(latent_a, latent_b))
    ref = jax.block_until_ready(_mmd_loss_ref(latent_a, latent_b))
    assert jnp.allclose(loss, ref, rtol=1e-4, atol=1e-5), (loss, ref)

    # Case 2: D = 4*16*20 = 1280, auto-sized single full-width step.
    latent_c = jax.random.normal(kc, (2, 4, 16, 20), dtype=jnp.float32)
    latent_d = jax.random.normal(kd, (2, 4, 16, 20), dtype=jnp.float32)
    loss2 = jax.block_until_ready(mmd_loss(latent_c, latent_d))
    ref2 = jax.block_until_ready(_mmd_loss_ref(latent_c, latent_d))
    assert jnp.allclose(loss2, ref2, rtol=1e-4, atol=1e-5), (loss2, ref2)

    # Case 3: same data, forced td=512 -> 3 grid steps with a ragged last
    # tile (exercises the in-kernel tail mask instead of HBM padding).
    loss3 = jax.block_until_ready(mmd_loss(latent_c, latent_d, max_tile_d=512))
    assert jnp.allclose(loss3, ref2, rtol=1e-4, atol=1e-5), (loss3, ref2)

    # Case 4: D = 4*15*15 = 900 (not a multiple of 128), full-extent block.
    latent_e = jax.random.normal(ke, (2, 4, 15, 15), dtype=jnp.float32)
    latent_f = jax.random.normal(kf, (2, 4, 15, 15), dtype=jnp.float32)
    loss4 = jax.block_until_ready(mmd_loss(latent_e, latent_f))
    ref4 = jax.block_until_ready(_mmd_loss_ref(latent_e, latent_f))
    assert jnp.allclose(loss4, ref4, rtol=1e-4, atol=1e-5), (loss4, ref4)

    print("KERNEL_OK")
</pallas_src>

<mosaic_0001>
module attributes {stable_mosaic.version = 11 : i64} {
  func.func @_mmd_kernel(%arg0: i32, %arg1: memref<2x1024xf32, #tpu.memory_space<vmem>>, %arg2: memref<2x1024xf32, #tpu.memory_space<vmem>>, %arg3: memref<1xf32, #tpu.memory_space<smem>>, %arg4: memref<2x2xf32, #tpu.memory_space<vmem>>, %arg5: memref<2x2xf32, #tpu.memory_space<vmem>>, %arg6: memref<2x2xf32, #tpu.memory_space<vmem>>) attributes {dimension_semantics = [#tpu.dimension_semantics<arbitrary>], iteration_bounds = array<i64: 1>, scalar_prefetch = 0 : i64, scratch_operands = 3 : i64, tpu.core_type = #tpu.core_type<tc>, window_params = [{transform_indices = @transform_0, window_bounds = array<i64: 2, 1024>}, {transform_indices = @transform_1, window_bounds = array<i64: 2, 1024>}, {transform_indices = @transform_2, window_bounds = array<i64: 1>}]} {
    %c0_i32 = arith.constant 0 : i32
    %0 = arith.cmpi eq, %arg0, %c0_i32 : i32
    %1 = arith.extui %0 : i1 to i32
    %c0_i32_0 = arith.constant 0 : i32
    %2 = arith.cmpi ne, %1, %c0_i32_0 : i32
    scf.if %2 {
      %cst_20 = arith.constant 0.000000e+00 : f32
      %20 = vector.broadcast %cst_20 : f32 to vector<2x2xf32>
      %c0_21 = arith.constant 0 : index
      %c0_22 = arith.constant 0 : index
      %21 = vector.load %arg4[%c0_21, %c0_22] : memref<2x2xf32, #tpu.memory_space<vmem>>, vector<2x2xf32>
      tpu.vector_store %arg4[%c0_21, %c0_22], %20 {strides = array<i32>} : memref<2x2xf32, #tpu.memory_space<vmem>>, vector<2x2xf32>,
      %cst_23 = arith.constant 0.000000e+00 : f32
      %22 = vector.broadcast %cst_23 : f32 to vector<2x2xf32>
      %c0_24 = arith.constant 0 : index
      %c0_25 = arith.constant 0 : index
      %23 = vector.load %arg5[%c0_24, %c0_25] : memref<2x2xf32, #tpu.memory_space<vmem>>, vector<2x2xf32>
      tpu.vector_store %arg5[%c0_24, %c0_25], %22 {strides = array<i32>} : memref<2x2xf32, #tpu.memory_space<vmem>>, vector<2x2xf32>,
      %cst_26 = arith.constant 0.000000e+00 : f32
      %24 = vector.broadcast %cst_26 : f32 to vector<2x2xf32>
      %c0_27 = arith.constant 0 : index
      %c0_28 = arith.constant 0 : index
      %25 = vector.load %arg6[%c0_27, %c0_28] : memref<2x2xf32, #tpu.memory_space<vmem>>, vector<2x2xf32>
      tpu.vector_store %arg6[%c0_27, %c0_28], %24 {strides = array<i32>} : memref<2x2xf32, #tpu.memory_space<vmem>>, vector<2x2xf32>,
    } else {
    }
    %c0 = arith.constant 0 : index
    %c0_1 = arith.constant 0 : index
    %3 = vector.load %arg1[%c0, %c0_1] : memref<2x1024xf32, #tpu.memory_space<vmem>>, vector<2x1024xf32>
    %c0_2 = arith.constant 0 : index
    %c0_3 = arith.constant 0 : index
    %4 = vector.load %arg2[%c0_2, %c0_3] : memref<2x1024xf32, #tpu.memory_space<vmem>>, vector<2x1024xf32>
    %c0_4 = arith.constant 0 : index
    %c0_5 = arith.constant 0 : index
    %5 = vector.load %arg4[%c0_4, %c0_5] : memref<2x2xf32, #tpu.memory_space<vmem>>, vector<2x2xf32>
    %cst = arith.constant dense<0.000000e+00> : vector<2x2xf32>
    %6 = tpu.matmul %3, %3, %cst {dimension_numbers = #tpu.dot_dimension_numbers<[1], [1], [0], [0], [0, 0, 1, 0], [], []>} : vector<2x1024xf32>, vector<2x1024xf32>, vector<2x2xf32> -> vector<2x2xf32>
    %7 = arith.addf %5, %6 : vector<2x2xf32>
    %c0_6 = arith.constant 0 : index
    %c0_7 = arith.constant 0 : index
    %8 = vector.load %arg4[%c0_6, %c0_7] : memref<2x2xf32, #tpu.memory_space<vmem>>, vector<2x2xf32>
    tpu.vector_store %arg4[%c0_6, %c0_7], %7 {strides = array<i32>} : memref<2x2xf32, #tpu.memory_space<vmem>>, vector<2x2xf32>,
    %c0_8 = arith.constant 0 : index
    %c0_9 = arith.constant 0 : index
    %9 = vector.load %arg5[%c0_8, %c0_9] : memref<2x2xf32, #tpu.memory_space<vmem>>, vector<2x2xf32>
    %cst_10 = arith.constant dense<0.000000e+00> : vector<2x2xf32>
    %10 = tpu.matmul %4, %4, %cst_10 {dimension_numbers = #tpu.dot_dimension_numbers<[1], [1], [0], [0], [0, 0, 1, 0], [], []>} : vector<2x1024xf32>, vector<2x1024xf32>, vector<2x2xf32> -> vector<2x2xf32>
    %11 = arith.addf %9, %10 : vector<2x2xf32>
    %c0_11 = arith.constant 0 : index
    %c0_12 = arith.constant 0 : index
    %12 = vector.load %arg5[%c0_11, %c0_12] : memref<2x2xf32, #tpu.memory_space<vmem>>, vector<2x2xf32>
    tpu.vector_store %arg5[%c0_11, %c0_12], %11 {strides = array<i32>} : memref<2x2xf32, #tpu.memory_space<vmem>>, vector<2x2xf32>,
    %c0_13 = arith.constant 0 : index
    %c0_14 = arith.constant 0 : index
    %13 = vector.load %arg6[%c0_13, %c0_14] : memref<2x2xf32, #tpu.memory_space<vmem>>, vector<2x2xf32>
    %cst_15 = arith.constant dense<0.000000e+00> : vector<2x2xf32>
    %14 = tpu.matmul %3, %4, %cst_15 {dimension_numbers = #tpu.dot_dimension_numbers<[1], [1], [0], [0], [0, 0, 1, 0], [], []>} : vector<2x1024xf32>, vector<2x1024xf32>, vector<2x2xf32> -> vector<2x2xf32>
    %15 = arith.addf %13, %14 : vector<2x2xf32>
    %c0_16 = arith.constant 0 : index
    %c0_17 = arith.constant 0 : index
    %16 = vector.load %arg6[%c0_16, %c0_17] : memref<2x2xf32, #tpu.memory_space<vmem>>, vector<2x2xf32>
    tpu.vector_store %arg6[%c0_16, %c0_17], %15 {strides = array<i32>} : memref<2x2xf32, #tpu.memory_space<vmem>>, vector<2x2xf32>,
    %c0_i32_18 = arith.constant 0 : i32
    %17 = arith.cmpi eq, %arg0, %c0_i32_18 : i32
    %18 = arith.extui %17 : i1 to i32
    %c0_i32_19 = arith.constant 0 : i32
    %19 = arith.cmpi ne, %18, %c0_i32_19 : i32
    scf.if %19 {
      %c0_20 = arith.constant 0 : index
      %c0_21 = arith.constant 0 : index
      %20 = vector.load %arg4[%c0_20, %c0_21] : memref<2x2xf32, #tpu.memory_space<vmem>>, vector<2x2xf32>
      %c0_22 = arith.constant 0 : index
      %c0_23 = arith.constant 0 : index
      %21 = vector.load %arg5[%c0_22, %c0_23] : memref<2x2xf32, #tpu.memory_space<vmem>>, vector<2x2xf32>
      %c0_24 = arith.constant 0 : index
      %c0_25 = arith.constant 0 : index
      %22 = vector.load %arg6[%c0_24, %c0_25] : memref<2x2xf32, #tpu.memory_space<vmem>>, vector<2x2xf32>
      %23 = tpu.iota {dimensions = array<i32: 0>} : vector<2x2xi32>
      %24 = tpu.iota {dimensions = array<i32: 1>} : vector<2x2xi32>
      %25 = arith.cmpi eq, %23, %24 : vector<2x2xi32>
      %cst_26 = arith.constant 0.000000e+00 : f32
      %26 = vector.broadcast %cst_26 : f32 to vector<2x2xf32>
      %27 = arith.select %25, %20, %26 : vector<2x2xi1>, vector<2x2xf32>
      %cst_27 = arith.constant 0.000000e+00 : f32
      %28 = vector.broadcast %cst_27 : f32 to vector<2x2xf32>
      %29 = arith.select %25, %21, %28 : vector<2x2xi1>, vector<2x2xf32>
      %cst_28 = arith.constant dense<0.000000e+00> : vector<2xf32>
      %30 = vector.multi_reduction <add>, %27, %cst_28 [1] : vector<2x2xf32> to vector<2xf32>
      %31 = vector.shape_cast %30 : vector<2xf32> to vector<2x1xf32>
      %cst_29 = arith.constant dense<0.000000e+00> : vector<2xf32>
      %32 = vector.multi_reduction <add>, %27, %cst_29 [0] : vector<2x2xf32> to vector<2xf32>
      %33 = vector.shape_cast %32 : vector<2xf32> to vector<1x2xf32>
      %cst_30 = arith.constant dense<0.000000e+00> : vector<2xf32>
      %34 = vector.multi_reduction <add>, %29, %cst_30 [1] : vector<2x2xf32> to vector<2xf32>
      %35 = vector.shape_cast %34 : vector<2xf32> to vector<2x1xf32>
      %cst_31 = arith.constant dense<0.000000e+00> : vector<2xf32>
      %36 = vector.multi_reduction <add>, %29, %cst_31 [0] : vector<2x2xf32> to vector<2xf32>
      %37 = vector.shape_cast %36 : vector<2xf32> to vector<1x2xf32>
      %38 = vector.broadcast %31 : vector<2x1xf32> to vector<2x2xf32>
      %39 = vector.broadcast %33 : vector<1x2xf32> to vector<2x2xf32>
      %40 = arith.addf %38, %39 : vector<2x2xf32>
      %cst_32 = arith.constant 2.000000e+00 : f32
      %41 = vector.broadcast %cst_32 : f32 to vector<2x2xf32>
      %42 = arith.mulf %41, %20 : vector<2x2xf32>
      %43 = arith.subf %40, %42 : vector<2x2xf32>
      %cst_33 = arith.constant 0.000000e+00 : f32
      %44 = vector.broadcast %cst_33 : f32 to vector<2x2xf32>
      %45 = arith.maximumf %43, %44 : vector<2x2xf32>
      %cst_34 = arith.constant 0.000000e+00 : f32
      %46 = vector.broadcast %cst_34 : f32 to vector<2x2xf32>
      %47 = arith.subf %46, %45 : vector<2x2xf32>
      %cst_35 = arith.constant 9.53674316E-7 : f32
      %48 = vector.broadcast %cst_35 : f32 to vector<2x2xf32>
      %49 = arith.mulf %47, %48 : vector<2x2xf32>
      %50 = math.exp %49 : vector<2x2xf32>
      %51 = vector.shape_cast %50 : vector<2x2xf32> to vector<1x2x2xf32>
      %cst_36 = arith.constant dense<0.000000e+00> : vector<1xf32>
      %52 = vector.multi_reduction <add>, %51, %cst_36 [1, 2] : vector<1x2x2xf32> to vector<1xf32>
      %53 = vector.shape_cast %52 : vector<1xf32> to vector<1x1x1xf32>
      %54 = vector.extract %53[0, 0, 0] : f32 from vector<1x1x1xf32>
      %55 = vector.broadcast %35 : vector<2x1xf32> to vector<2x2xf32>
      %56 = vector.broadcast %37 : vector<1x2xf32> to vector<2x2xf32>
      %57 = arith.addf %55, %56 : vector<2x2xf32>
      %cst_37 = arith.constant 2.000000e+00 : f32
      %58 = vector.broadcast %cst_37 : f32 to vector<2x2xf32>
      %59 = arith.mulf %58, %21 : vector<2x2xf32>
      %60 = arith.subf %57, %59 : vector<2x2xf32>
      %cst_38 = arith.constant 0.000000e+00 : f32
      %61 = vector.broadcast %cst_38 : f32 to vector<2x2xf32>
      %62 = arith.maximumf %60, %61 : vector<2x2xf32>
      %cst_39 = arith.constant 0.000000e+00 : f32
      %63 = vector.broadcast %cst_39 : f32 to vector<2x2xf32>
      %64 = arith.subf %63, %62 : vector<2x2xf32>
      %cst_40 = arith.constant 9.53674316E-7 : f32
      %65 = vector.broadcast %cst_40 : f32 to vector<2x2xf32>
      %66 = arith.mulf %64, %65 : vector<2x2xf32>
      %67 = math.exp %66 : vector<2x2xf32>
      %68 = vector.shape_cast %67 : vector<2x2xf32> to vector<1x2x2xf32>
      %cst_41 = arith.constant dense<0.000000e+00> : vector<1xf32>
      %69 = vector.multi_reduction <add>, %68, %cst_41 [1, 2] : vector<1x2x2xf32> to vector<1xf32>
      %70 = vector.shape_cast %69 : vector<1xf32> to vector<1x1x1xf32>
      %71 = vector.extract %70[0, 0, 0] : f32 from vector<1x1x1xf32>
      %72 = arith.addf %54, %71 : f32
      %73 = vector.broadcast %31 : vector<2x1xf32> to vector<2x2xf32>
      %74 = vector.broadcast %37 : vector<1x2xf32> to vector<2x2xf32>
      %75 = arith.addf %73, %74 : vector<2x2xf32>
      %cst_42 = arith.constant 2.000000e+00 : f32
      %76 = vector.broadcast %cst_42 : f32 to vector<2x2xf32>
      %77 = arith.mulf %76, %22 : vector<2x2xf32>
      %78 = arith.subf %75, %77 : vector<2x2xf32>
      %cst_43 = arith.constant 0.000000e+00 : f32
      %79 = vector.broadcast %cst_43 : f32 to vector<2x2xf32>
      %80 = arith.maximumf %78, %79 : vector<2x2xf32>
      %cst_44 = arith.constant 0.000000e+00 : f32
      %81 = vector.broadcast %cst_44 : f32 to vector<2x2xf32>
      %82 = arith.subf %81, %80 : vector<2x2xf32>
      %cst_45 = arith.constant 9.53674316E-7 : f32
      %83 = vector.broadcast %cst_45 : f32 to vector<2x2xf32>
      %84 = arith.mulf %82, %83 : vector<2x2xf32>
      %85 = math.exp %84 : vector<2x2xf32>
      %86 = vector.shape_cast %85 : vector<2x2xf32> to vector<1x2x2xf32>
      %cst_46 = arith.constant dense<0.000000e+00> : vector<1xf32>
      %87 = vector.multi_reduction <add>, %86, %cst_46 [1, 2] : vector<1x2x2xf32> to vector<1xf32>
      %88 = vector.shape_cast %87 : vector<1xf32> to vector<1x1x1xf32>
      %89 = vector.extract %88[0, 0, 0] : f32 from vector<1x1x1xf32>
      %cst_47 = arith.constant 2.000000e+00 : f32
      %90 = arith.mulf %cst_47, %89 : f32
      %91 = arith.subf %72, %90 : f32
      %cst_48 = arith.constant 2.500000e-01 : f32
      %92 = arith.mulf %91, %cst_48 : f32
      %c0_49 = arith.constant 0 : index
      %93 = memref.load %arg3[%c0_49] : memref<1xf32, #tpu.memory_space<smem>>
      memref.store %92, %arg3[%c0_49] : memref<1xf32, #tpu.memory_space<smem>>
    } else {
    }
    return
  }
  func.func @transform_0(%arg0: i32) -> (i32, i32) {
    %c0_i32 = arith.constant 0 : i32
    %c0_i32_0 = arith.constant 0 : i32
    return %c0_i32, %arg0 : i32, i32
  }
  func.func @transform_1(%arg0: i32) -> (i32, i32) {
    %c0_i32 = arith.constant 0 : i32
    %c0_i32_0 = arith.constant 0 : i32
    return %c0_i32, %arg0 : i32, i32
  }
  func.func @transform_2(%arg0: i32) -> i32 {
    %c0_i32 = arith.constant 0 : i32
    %c0_i32_0 = arith.constant 0 : i32
    return %c0_i32 : i32
  }
}

</mosaic_0001>

<bundles_post_ra>
// kernel: tpu_custom_call.1
= control target key start
LH: loop header
LB: loop body
LE: loop exit
PB: predicated region body
PF: predicated region fallthrough
CT: control target
= control target key end

     0   :  { %7 = vsyncpa [#allocation6], 0  ;;  %s1224_s0 = inlined_call_operand.hbm [shape: f32[2,1024], index: 0, kind: input, shape index: {}]   ;;  %s1225_s1 = inlined_call_operand.hbm [shape: f32[2,1024], index: 1, kind: input, shape index: {}]   ;;  %s1226_s2 = inlined_call_operand.hbm [shape: f32[1], index: 2, kind: output, shape index: {}]  }
   0x1   :  { %8 = vsyncpa [#allocation9], 0 }
   0x2   :  { %9 = vsyncpa [#allocation7], 0  ;;  %s1167_s9 = smov [#allocation5]   ;;  %s1168_s11 = smov [#allocation8]  }
   0x3   :  { %s16_s10 = sshll.u32 %s1167_s9, 4  ;;  %s26_s12 = sshll.u32 %s1168_s11, 4  ;;  %s17_s10 = int_to_ptr.vmem [resolvable:$true] %s16_s10  ;;  %s27_s12 = int_to_ptr.vmem [resolvable:$true] %s26_s12 }
   0x4   :  { %s1121_s13 = scalar_lea.vmem %s17_s10, 256  ;;  %p1126_p1 = scmp.lt.s32.totalorder %s17_s10, %s17_s10 }
   0x5   :  { %p1122_p0 = scmp.ne.s32.totalorder %s17_s10, %s1121_s13  ;;  %p1127_p2 = scmp.lt.s32.totalorder %s1121_s13, %s1121_s13 }
   0x7   :  { %p1128_p3 = por %p1127_p2, %p1126_p1 }
   0x9   :  { %p1129_p4 = pnand %p1128_p3, %p1122_p0 }
   0xb   :  { %1132 = shalt.err (!%p1129_p4)
}
   0xc   :  { %19 = dma.hbm_to_vmem [thread:$0]  %s1224_s0, 256, %s17_s10, [#allocation6]  }
   0xd   :  { %s1141_s16 = scalar_lea.vmem %s27_s12, 256  ;;  %p1146_p6 = scmp.lt.s32.totalorder %s27_s12, %s27_s12 }
   0xe   :  { %p1142_p5 = scmp.ne.s32.totalorder %s27_s12, %s1141_s16  ;;  %p1147_p7 = scmp.lt.s32.totalorder %s1141_s16, %s1141_s16 }
  0x10   :  { %p1148_p8 = por %p1147_p7, %p1146_p6 }
  0x12   :  { %p1149_p9 = pnand %p1148_p8, %p1142_p5 }
  0x14   :  { %1152 = shalt.err (!%p1149_p9)
}
  0x15   :  { %29 = dma.hbm_to_vmem [thread:$0]  %s1225_s1, 256, %s27_s12, [#allocation9]  }
  0x16   :  { %1161 = dma.done.wait [#allocation6], 256  }
  0x17   :  { %1162 = vsyncadd [#allocation6], 4294967040 }
  0x18   :  { %1163 = dma.done.wait [#allocation9], 256  }
  0x19   :  { %1164 = vsyncadd [#allocation9], 4294967040  ;;  %v55_v0 = vlaneseq  ;;  %v1169_v1 = vmov 1983009808   ;;  %v44_v6 = vld [vmem:[#allocation5] sm:$0xff]  ;;  %v45_v7 = vld [vmem:[#allocation5 + $0x8] sm:$0xff] }
  0x1a   :  { %v53_v2 = vunpack.c.l.s4 %v1169_v1  ;;  %v46_v8 = vld [vmem:[#allocation8] sm:$0xff]  ;;  %v51_v10 = vcombine.high %v44_v6, %v44_v6  ;;  %v68_v12 = vcombine.high %v45_v7, %v45_v7  ;;  %v47_v13 = vld [vmem:[#allocation8 + $0x8] sm:$0xff]  ;;  %vm40_vm0 = vcmask 9216   ;;  %s1171_s24 = smov [#allocation10]  }
  0x1b   :  { %v1194_v3 = vshrl.u32 %v55_v0, 7  ;;  %v379_v15 = vcombine.high %v46_v8, %v46_v8  ;;  %v396_v20 = vcombine.high %v47_v13, %v47_v13  ;;  %v1170_v30 = vmov 0.0  }
  0x1c   :  { %v54_v4 = vunpack.c.0.s8 %v53_v2  ;;  %41 = vst.msk [vmem:[#allocation2] sm:$0x3] %vm40_vm0, %v1170_v30  ;;  %42 = vst.msk [vmem:[#allocation3] sm:$0x3] %vm40_vm0, %v1170_v30  ;;  %v995_v50 = vand.u32 127, %v55_v0 }
  0x1d   :  { %43 = vst.msk [vmem:[#allocation4] sm:$0x3] %vm40_vm0, %v1170_v30 }
  0x1e   :  { %v57_v5 = vsub.s32 %v54_v4, %v1194_v3  ;;  %vm996_vm1 = vcmp.eq.s32.totalorder %v1194_v3, %v995_v50 }
  0x20   :  { %v58_v9 = vrot.slane %v44_v6, %v57_v5  ;;  %v1197_v11 = vrot.slane %v45_v7, %v57_v5  ;;  %v386_v14 = vrot.slane %v46_v8, %v57_v5  ;;  %v65_v17 = vrot.slane %v51_v10, %v57_v5 }
  0x21   :  { %v82_v19 = vrot.slane %v68_v12, %v57_v5  ;;  %v393_v23 = vrot.slane %v379_v15, %v57_v5  ;;  %v403_v25 = vrot.slane %v47_v13, %v57_v5  ;;  %v410_v27 = vrot.slane %v396_v20, %v57_v5 }
  0x22   :  { %v66_v16 = vcombine.high %v58_v9, %v58_v9  ;;  %v83_v18 = vcombine.high %v1197_v11, %v1197_v11  ;;  %v67_v21 = vcombine.high %v65_v17, %v65_v17  ;;  %v394_v24 = vcombine.high %v386_v14, %v386_v14 }
  0x23   :  { %v84_v22 = vcombine.high %v82_v19, %v82_v19  ;;  %v395_v26 = vcombine.high %v393_v23, %v393_v23  ;;  %v411_v28 = vcombine.high %v403_v25, %v403_v25  ;;  %v412_v29 = vcombine.high %v410_v27, %v410_v27  ;;  %v48_v39 = vld [vmem:[#allocation2] sm:$0x3]  ;;  %v376_v53 = vld [vmem:[#allocation3] sm:$0x3] }
  0x24   :  { %123 = vmatprep.subr.mxu0 %v66_v16  ;;  %157 = vmatprep.mubr.f32.mxu0 %v66_v16  ;;  %v703_v5 = vld [vmem:[#allocation4] sm:$0x3] }
  0x25   :  { %124 = vmatpush1.xpose.msra.mxu0 %v58_v9  ;;  %193 = vmatprep.subr.mxu1 %v67_v21 }
  0x26   :  { %263 = vmatprep.subr.mxu0 %v83_v18  ;;  %194 = vmatpush1.xpose.msra.mxu1 %v65_v17 }
  0x27   :  { %227 = vmatprep.mubr.f32.mxu1 %v67_v21  ;;  %333 = vmatprep.subr.mxu1 %v84_v22 }
  0x28   :  { %158 = vmatmul.mubr.f32.vlgmr.msra.gmra.mxu0 %v58_v9 }
  0x29   :  { %264 = vmatpush1.xpose.msra.mxu0 %v1197_v11  ;;  %297 = vmatprep.mubr.f32.mxu0 %v83_v18 }
  0x2a   :  { %228 = vmatmul.mubr.f32.vlgmr.msra.gmra.mxu1 %v65_v17  ;;  %451 = vmatprep.subr.mxu0 %v394_v24 }
  0x2b   :  { %334 = vmatpush1.xpose.msra.mxu1 %v82_v19  ;;  %367 = vmatprep.mubr.f32.mxu1 %v84_v22 }
  0x2c   :  { %298 = vmatmul.mubr.f32.vlgmr.msra.gmra.mxu0 %v1197_v11  ;;  %521 = vmatprep.subr.mxu1 %v395_v26 }
  0x2d   :  { %452 = vmatpush1.xpose.msra.mxu0 %v386_v14  ;;  %485 = vmatprep.mubr.f32.mxu0 %v394_v24 }
  0x2e   :  { %368 = vmatmul.mubr.f32.vlgmr.msra.gmra.mxu1 %v82_v19  ;;  %591 = vmatprep.subr.mxu0 %v411_v28 }
  0x2f   :  { %522 = vmatpush1.xpose.msra.mxu1 %v393_v23  ;;  %555 = vmatprep.mubr.f32.mxu1 %v395_v26 }
  0x30   :  { %486 = vmatmul.mubr.f32.vlgmr.msra.gmra.mxu0 %v386_v14  ;;  %661 = vmatprep.subr.mxu1 %v412_v29 }
  0x31   :  { %592 = vmatpush1.xpose.msra.mxu0 %v403_v25  ;;  %625 = vmatprep.mubr.f32.mxu0 %v411_v28 }
  0x32   :  { %556 = vmatmul.mubr.f32.vlgmr.msra.gmra.mxu1 %v393_v23  ;;  %734 = vmatprep.subr.mxu0 %v394_v24 }
  0x33   :  { %662 = vmatpush1.xpose.msra.mxu1 %v410_v27  ;;  %695 = vmatprep.mubr.f32.mxu1 %v412_v29 }
  0x34   :  { %626 = vmatmul.mubr.f32.vlgmr.msra.gmra.mxu0 %v403_v25  ;;  %804 = vmatprep.subr.mxu1 %v395_v26 }
  0x35   :  { %735 = vmatpush1.xpose.msra.mxu0 %v386_v14  ;;  %768 = vmatprep.mubr.f32.mxu0 %v66_v16 }
  0x36   :  { %696 = vmatmul.mubr.f32.vlgmr.msra.gmra.mxu1 %v410_v27  ;;  %874 = vmatprep.subr.mxu0 %v411_v28 }
  0x37   :  { %805 = vmatpush1.xpose.msra.mxu1 %v393_v23  ;;  %838 = vmatprep.mubr.f32.mxu1 %v67_v21 }
  0x38   :  { %769 = vmatmul.mubr.f32.vlgmr.msra.gmra.mxu0 %v58_v9  ;;  %944 = vmatprep.subr.mxu1 %v412_v29 }
  0x39   :  { %875 = vmatpush1.xpose.msra.mxu0 %v403_v25  ;;  %908 = vmatprep.mubr.f32.mxu0 %v83_v18 }
  0x3a   :  { %839 = vmatmul.mubr.f32.vlgmr.msra.gmra.mxu1 %v65_v17 }
  0x3b   :  { %945 = vmatpush1.xpose.msra.mxu1 %v410_v27  ;;  %978 = vmatprep.mubr.f32.mxu1 %v84_v22 }
  0x3c   :  { %909 = vmatmul.mubr.f32.vlgmr.msra.gmra.mxu0 %v1197_v11 }
  0x3e   :  { %979 = vmatmul.mubr.f32.vlgmr.msra.gmra.mxu1 %v82_v19 }
  0xe8   :  { %v159_v31 = vpop.f32.mrf.mxu0 }
  0xea   :  { %v161_v32 = vpop.f32.mrf.mxu0  ;;  %v229_v33 = vpop.f32.mrf.mxu1 }
  0xeb   :  { %v230_v34 = vadd.f32 %v229_v33, %v159_v31 }
  0xec   :  { %v231_v35 = vpop.f32.mrf.mxu1  ;;  %v299_v36 = vpop.f32.mrf.mxu0 }
  0xed   :  { %v300_v37 = vadd.f32 %v299_v36, %v230_v34 }
  0xee   :  { %v301_v38 = vpop.f32.mrf.mxu0  ;;  %v369_v40 = vpop.f32.mrf.mxu1 }
  0xef   :  { %v370_v41 = vadd.f32 %v369_v40, %v300_v37 }
  0xf0   :  { %v371_v42 = vpop.f32.mrf.mxu1  ;;  %v487_v43 = vpop.f32.mrf.mxu0 }
  0xf1   :  { %v373_v44 = vadd.f32 %v370_v41, %v48_v39 }
  0xf2   :  { %v489_v45 = vpop.f32.mrf.mxu0  ;;  %v557_v46 = vpop.f32.mrf.mxu1 }
  0xf3   :  { %375 = vst.msk [vmem:[#allocation2] sm:$0x3] %vm40_vm0, %v373_v44  ;;  %v558_v47 = vadd.f32 %v557_v46, %v487_v43 }
  0xf4   :  { %v559_v48 = vpop.f32.mrf.mxu1  ;;  %v627_v49 = vpop.f32.mrf.mxu0 }
  0xf5   :  { %v628_v51 = vadd.f32 %v627_v49, %v558_v47 }
  0xf6   :  { %v629_v52 = vpop.f32.mrf.mxu0  ;;  %v697_v54 = vpop.f32.mrf.mxu1 }
  0xf7   :  { %v698_v55 = vadd.f32 %v697_v54, %v628_v51 }
  0xf8   :  { %v699_v56 = vpop.f32.mrf.mxu1  ;;  %v770_v57 = vpop.f32.mrf.mxu0 }
  0xf9   :  { %v701_v58 = vadd.f32 %v698_v55, %v376_v53 }
  0xfa   :  { %v989_v59 = vld [vmem:[#allocation2] sm:$0x3]  ;;  %v772_v60 = vpop.f32.mrf.mxu0  ;;  %v840_v61 = vpop.f32.mrf.mxu1 }
  0xfb   :  { %702 = vst.msk [vmem:[#allocation3] sm:$0x3] %vm40_vm0, %v701_v58  ;;  %v997_v62 = vsel %vm996_vm1, %v989_v59, 0.0  ;;  %v841_v63 = vadd.f32 %v840_v61, %v770_v57  ;;  %v1018_v28 = vmul.f32 2.0, %v989_v59 }
  0xfc   :  { %v999_v0 = vsel %vm40_vm0, %v997_v62, 0.0  ;;  %v842_v1 = vpop.f32.mrf.mxu1  ;;  %v910_v2 = vpop.f32.mrf.mxu0 }
  0xfd   :  { %1000 = vadd.xlane.f32.xlu0 %v999_v0  ;;  %v911_v4 = vadd.f32 %v910_v2, %v841_v63  ;;  %v1002_v14 = vrot.slane %v999_v0, 4 }
  0xfe   :  { %v980_v6 = vpop.f32.mrf.mxu1  ;;  %v912_v7 = vpop.f32.mrf.mxu0 }
  0xff   :  { %v981_v8 = vadd.f32 %v980_v6, %v911_v4  ;;  %v1003_v16 = vadd.f32 %v1002_v14, %v999_v0 }
 0x100   :  { %v982_v9 = vpop.f32.mrf.mxu1 }
 0x101   :  { %v984_v10 = vadd.f32 %v981_v8, %v703_v5  ;;  %v1004_v18 = vrot.slane %v1003_v16, 2 }
 0x102   :  { %v990_v11 = vld [vmem:[#allocation3] sm:$0x3] }
 0x103   :  { %v998_v12 = vsel %vm996_vm1, %v990_v11, 0.0  ;;  %985 = vst.msk [vmem:[#allocation4] sm:$0x3] %vm40_vm0, %v984_v10  ;;  %v1005_v21 = vadd.f32 %v1004_v18, %v1003_v16  ;;  %v1036_v40 = vmul.f32 2.0, %v990_v11 }
 0x104   :  { %v1008_v13 = vsel %vm40_vm0, %v998_v12, 0.0 }
 0x105   :  { %1009 = vadd.xlane.f32.xlu0 %v1008_v13  ;;  %v1011_v15 = vrot.slane %v1008_v13, 4  ;;  %v1006_v23 = vrot.slane %v1005_v21, 1 }
 0x107   :  { %v1012_v17 = vadd.f32 %v1011_v15, %v1008_v13  ;;  %v1007_v3 = vadd.f32 %v1006_v23, %v1005_v21 }
 0x109   :  { %v1013_v19 = vrot.slane %v1012_v17, 2 }
 0x10a   :  { %v991_v24 = vld [vmem:[#allocation4] sm:$0x3] }
 0x10b   :  { %v1014_v20 = vadd.f32 %v1013_v19, %v1012_v17  ;;  %v1055_v26 = vmul.f32 2.0, %v991_v24 }
 0x10d   :  { %v1015_v22 = vrot.slane %v1014_v20, 1 }
 0x10f   :  { %v1016_v25 = vadd.f32 %v1015_v22, %v1014_v20 }
 0x186   :  { %v1001_v27 = vpop.xlane.xlu0 %1000 }
 0x187   :  { %v1017_v29 = vadd.f32 %v1007_v3, %v1001_v27  ;;  %v1054_v30 = vadd.f32 %v1016_v25, %v1001_v27 }
 0x189   :  { %v1019_v31 = vsub.f32 %v1017_v29, %v1018_v28  ;;  %v1056_v32 = vsub.f32 %v1054_v30, %v1055_v26 }
 0x18b   :  { %v1020_v33 = vmax.f32 %v1019_v31, 0.0  ;;  %v1057_v34 = vmax.f32 %v1056_v32, 0.0 }
 0x18d   :  { %v1021_v35 = vsub.f32 0.0, %v1020_v33  ;;  %v1058_v36 = vsub.f32 0.0, %v1057_v34 }
 0x18e   :  { %v1010_v37 = vpop.xlane.xlu0 %1009 }
 0x18f   :  { %v1022_v38 = vmul.f32 9.536743e-07, %v1021_v35  ;;  %v1059_v39 = vmul.f32 9.536743e-07, %v1058_v36  ;;  %v1035_v41 = vadd.f32 %v1016_v25, %v1010_v37 }
 0x191   :  { %v1023_v42 = vmul.f32 1.442695, %v1022_v38  ;;  %v1060_v43 = vmul.f32 1.442695, %v1059_v39  ;;  %v1037_v44 = vsub.f32 %v1035_v41, %v1036_v40 }
 0x193   :  { %1107 = vpow2.f32 %v1023_v42  ;;  %v1038_v45 = vmax.f32 %v1037_v44, 0.0 }
 0x194   :  { %1109 = vpow2.f32 %v1060_v43 }
 0x195   :  { %v1039_v46 = vsub.f32 0.0, %v1038_v45 }
 0x197   :  { %v1040_v47 = vmul.f32 9.536743e-07, %v1039_v46 }
 0x199   :  { %v1041_v48 = vmul.f32 1.442695, %v1040_v47 }
 0x19b   :  { %1111 = vpow2.f32 %v1041_v48 }
 0x1a0   :  { %v1108_v49 = vpop.eup %1107 }
 0x1a1   :  { %v1110_v50 = vpop.eup %1109  ;;  %v1025_v51 = vsel %vm40_vm0, %v1108_v49, 0.0 }
 0x1a2   :  { %v1062_v52 = vsel %vm40_vm0, %v1110_v50, 0.0  ;;  %1026 = vadd.xlane.f32.xlu1 %v1025_v51 }
 0x1a3   :  { %1063 = vadd.xlane.f32.xlu0 %v1062_v52 }
 0x1a8   :  { %v1112_v53 = vpop.eup %1111 }
 0x1a9   :  { %v1043_v54 = vsel %vm40_vm0, %v1112_v53, 0.0 }
 0x1aa   :  { %1044 = vadd.xlane.f32.xlu1 %v1043_v54 }
 0x22b   :  { %v1027_v55 = vpop.xlane.xlu1 %1026 }
 0x22c   :  { %v1064_v56 = vpop.xlane.xlu0 %1063  ;;  %v1028_v57 = vrot.slane %v1027_v55, 4 }
 0x22d   :  { %v1065_v58 = vrot.slane %v1064_v56, 4 }
 0x22e   :  { %v1029_v59 = vadd.f32 %v1028_v57, %v1027_v55 }
 0x22f   :  { %v1066_v60 = vadd.f32 %v1065_v58, %v1064_v56 }
 0x230   :  { %v1030_v61 = vrot.slane %v1029_v59, 2 }
 0x231   :  { %v1067_v63 = vrot.slane %v1066_v60, 2 }
 0x232   :  { %v1031_v62 = vadd.f32 %v1030_v61, %v1029_v59 }
 0x233   :  { %v1045_v0 = vpop.xlane.xlu1 %1044  ;;  %v1068_v6 = vadd.f32 %v1067_v63, %v1066_v60 }
 0x234   :  { %v1046_v1 = vrot.slane %v1045_v0, 4  ;;  %v1032_v2 = vrot.slane %v1031_v62, 1 }
 0x235   :  { %v1069_v9 = vrot.slane %v1068_v6, 1 }
 0x236   :  { %v1047_v4 = vadd.f32 %v1046_v1, %v1045_v0  ;;  %v1033_v5 = vadd.f32 %v1032_v2, %v1031_v62 }
 0x237   :  { %v1070_v12 = vadd.f32 %v1069_v9, %v1068_v6 }
 0x238   :  { %v1048_v7 = vrot.slane %v1047_v4, 2  ;;  %1092 = vpush %v1033_v5 }
 0x23a   :  { %v1049_v8 = vadd.f32 %v1048_v7, %v1047_v4 }
 0x23c   :  { %v1050_v10 = vrot.slane %v1049_v8, 1 }
 0x23e   :  { %v1051_v11 = vadd.f32 %v1050_v10, %v1049_v8 }
 0x240   :  { %1094 = vpush %v1051_v11 }
 0x241   :  { %1096 = vpush %v1070_v12 }
 0x269   :  { %s1093_s0 = spop %1092 }
 0x271   :  { %s1095_s1 = spop %1094 }
 0x272   :  { %s1053_s19 = sadd.f32 %s1095_s1, %s1093_s0  ;;  %s1097_s20 = spop %1096 }
 0x273   :  { %s1072_s21 = smul.f32 2.0, %s1097_s20 }
 0x275   :  { %s1073_s22 = ssub.f32 %s1053_s19, %s1072_s21 }
 0x277   :  { %s1074_s23 = smul.f32 0.25, %s1073_s22 }
 0x279   :  { %1076 = sst [smem:[#allocation10]] %s1074_s23 }
 0x27a   :  { %1084 = dma.smem_to_hbm %s1171_s24, 16, %s1226_s2, [#allocation7]  }
 0x27b   :  { %1165 = dma.done.wait [#allocation7], 16  }
 0x27c   :  { %1166 = vsyncadd [#allocation7], 4294967280 }
 0x27d   :  { %1088 = sfence }
 0x27e   :  { %1089 = vsyncpa [#allocation6], 1 }
 0x27f   :  { %1090 = vsyncpa [#allocation9], 1 }
 0x280   :  { %1091 = vsyncpa [#allocation7], 1 }

</bundles_post_ra>
